<compile_context>
chip_gen: v7x
topology: tpu7x:2x2x1
jax: 0.10.0
libtpu: 0.0.40
codegen_flags: <defaults>
</compile_context>

<pallas_src>
import jax
import jax.numpy as jnp
from jax import lax
from jax.experimental import pallas as pl
from jax.experimental.pallas import tpu as pltpu


def _attention_block_kernel(g_ref, x_ref, p_ref, o_ref):
    """One (batch-block, spatial-tile) grid step.

    g_ref : [Bt, Cg,  T]    x_ref : [Bt, Cin, T]    o_ref : [Bt, Cin, T]
    p_ref : [Ci, Cg+Cin+3]  packed f32 params:
            cols [0:Cg)      = Wg^T
            cols [Cg:Cg+Cin) = Wx^T
            col  Cg+Cin      = bg + bx
            col  Cg+Cin+1    = Wpsi
            col  Cg+Cin+2    = bpsi (replicated over rows)

    All operations are lane-local and batch-local, so undefined lanes / batch
    rows of a clamped partial last block are harmless (their stores are
    masked out at the array boundary).
    """
    b_tile, cg, _ = g_ref.shape
    cin = x_ref.shape[1]

    p = p_ref[...]                                    # [Ci, ncol] f32 (tiny)
    cdt = g_ref.dtype
    wgt = p[:, :cg].astype(cdt)                       # [Ci, Cg]
    wxt = p[:, cg:cg + cin].astype(cdt)               # [Ci, Cin]
    b_comb = p[:, cg + cin:cg + cin + 1]              # [Ci, 1]  (= bg + bx)
    wpsi = p[:, cg + cin + 1:cg + cin + 2]            # [Ci, 1]
    bpsi = p[0:1, cg + cin + 2:cg + cin + 3]          # [1, 1]

    for b in range(b_tile):                           # static unroll
        g = g_ref[b]                                  # [Cg,  T]
        x = x_ref[b]                                  # [Cin, T]
        # 1x1 convs as MXU dots with f32 accumulation (VPU/XLU stay free).
        s = (jnp.dot(wgt, g, preferred_element_type=jnp.float32,
                     precision=lax.Precision.HIGHEST)
             + jnp.dot(wxt, x, preferred_element_type=jnp.float32,
                       precision=lax.Precision.HIGHEST))      # [Ci, T] f32
        h = jnp.maximum(s + b_comb, 0.0)                       # ReLU
        # psi logit: 8-sublane reduce (XLU), sigmoid on the EUP.
        logit = jnp.sum(h * wpsi, axis=0, keepdims=True) + bpsi   # [1, T]
        psi = jax.nn.sigmoid(logit)
        # Attention-gated output; lane-dense store.
        o_ref[b] = (x * psi.astype(x.dtype)).astype(o_ref.dtype)


def _round_up(v, m):
    return -(-v // m) * m


def _pick_tiles(n, hw, cg, cin, ci, itemsize, vmem_budget_bytes, max_tile):
    """Pick (batch_block, spatial_tile).

    The working-set estimate counts sublane padding (channel blocks pad to a
    multiple of 8 rows) and the f32 intermediates, so the budget is honest on
    v7x's 64 MiB VMEM as well as v5e/v6e's 128 MiB.
    """
    cg_p, cin_p, ci_p = (_round_up(c, 8) for c in (cg, cin, ci))
    # Bytes per spatial lane, per batch element of a block:
    io_per_lane = 2 * (cg_p + 2 * cin_p) * itemsize   # double-buffered g/x/out
    f32_per_lane = (ci_p + cin_p + 8) * 4             # h + gated x + psi scratch
    per_lane = io_per_lane + f32_per_lane

    t = (vmem_budget_bytes // per_lane) // 128 * 128
    t = max(128, min(int(t), int(max_tile)))
    # Legal tile: multiple of 128, or exactly the full spatial extent.
    tile = hw if t >= hw else t

    # Batch blocking: amortize the ~0.35 us per-grid-step cost on small maps,
    # targeting >= ~512 KiB of DMA per step.
    b_tile = 1
    if tile == hw:
        step_bytes = (cg_p + 2 * cin_p) * tile * itemsize
        target = 512 * 1024
        if step_bytes < target:
            b_tile = min(n, max(1, target // max(step_bytes, 1)))
            b_tile = min(b_tile, max(1, vmem_budget_bytes // (per_lane * tile)))

    # Keep >= 2 grid steps whenever possible so both v7x TensorCores get work.
    if pl.cdiv(n, b_tile) * pl.cdiv(hw, tile) < 2:
        if n >= 2:
            b_tile = pl.cdiv(n, 2)
        elif hw > 128 and tile == hw:
            tile = _round_up(pl.cdiv(hw, 2), 128)
    return int(b_tile), int(tile)


def attention_block(g, x, params, *, max_tile=32768,
                    vmem_budget_bytes=24 * 1024 * 1024):
    """g: [N, Cg, H, W], x: [N, Cin, H, W] (NCHW, like PyTorch). Returns NCHW."""
    wg, bg, wx, bx, wpsi, bpsi = params
    n, cg, hh, ww = g.shape
    _, cin, _, _ = x.shape
    ci = wg.shape[1]
    hw = hh * ww
    itemsize = jnp.dtype(x.dtype).itemsize

    # Pack all grid-invariant parameters into one tiny f32 operand.
    ncol = cg + cin + 3
    params_packed = jnp.concatenate(
        [jnp.asarray(wg, jnp.float32).T,                               # Wg^T
         jnp.asarray(wx, jnp.float32).T,                               # Wx^T
         (jnp.asarray(bg, jnp.float32)
          + jnp.asarray(bx, jnp.float32)).reshape(ci, 1),              # bg+bx
         jnp.asarray(wpsi, jnp.float32).reshape(ci, 1),                # Wpsi
         jnp.broadcast_to(jnp.asarray(bpsi, jnp.float32).reshape(1, 1),
                          (ci, 1))],                                   # bpsi
        axis=1)

    # NCHW -> [N, C, H*W]: pure view, no data movement, lane-dense spatial.
    g3 = g.reshape(n, cg, hw)
    x3 = x.reshape(n, cin, hw)

    b_tile, tile = _pick_tiles(n, hw, cg, cin, ci, itemsize,
                               vmem_budget_bytes, max_tile)
    grid = (pl.cdiv(n, b_tile), pl.cdiv(hw, tile))

    # Advisory cost: bandwidth-bound custom call (3 activation passes + params).
    flops = n * hw * (2 * cg * ci + 2 * cin * ci + 4 * ci + cin + 2)
    bytes_accessed = n * hw * (cg + 2 * cin) * itemsize + ci * ncol * 4
    cost = pl.CostEstimate(flops=flops, transcendentals=n * hw,
                           bytes_accessed=bytes_accessed)

    out = pl.pallas_call(
        _attention_block_kernel,
        out_shape=jax.ShapeDtypeStruct((n, cin, hw), x.dtype),
        grid=grid,
        in_specs=[
            pl.BlockSpec((b_tile, cg, tile), lambda b, s: (b, 0, s)),   # g tile
            pl.BlockSpec((b_tile, cin, tile), lambda b, s: (b, 0, s)),  # x tile
            pl.BlockSpec((ci, ncol), lambda b, s: (0, 0)),              # params
        ],
        out_specs=pl.BlockSpec((b_tile, cin, tile), lambda b, s: (b, 0, s)),
        compiler_params=pltpu.CompilerParams(
            dimension_semantics=("parallel", "parallel"),
            vmem_limit_bytes=40 * 1024 * 1024,
        ),
        cost_estimate=cost,
    )(g3, x3, params_packed)

    return out.reshape(n, cin, hh, ww)                # view back to NCHW


def init_params(key, gating_channels, in_channels, inter_channels):
    """Deterministic synthetic parameters matching the nn.Conv2d shapes.

    PyTorch Conv2d(Cg, Ci, 1) has weight [Ci, Cg, 1, 1]; for a 1x1 conv the
    matmul form is rows @ W^T, so we store the transposed [Cg, Ci] matrices.
    """
    k = jax.random.split(key, 6)
    wg = 0.1 * jax.random.normal(k[0], (gating_channels, inter_channels), jnp.float32)
    bg = 0.1 * jax.random.normal(k[1], (1, inter_channels), jnp.float32)
    wx = 0.1 * jax.random.normal(k[2], (in_channels, inter_channels), jnp.float32)
    bx = 0.1 * jax.random.normal(k[3], (1, inter_channels), jnp.float32)
    wpsi = 0.1 * jax.random.normal(k[4], (inter_channels, 1), jnp.float32)
    bpsi = 0.1 * jax.random.normal(k[5], (1, 1), jnp.float32)
    return wg, bg, wx, bx, wpsi, bpsi


def attention_block_ref(g, x, params):
    """Pure-JAX reference replicating the PyTorch forward exactly (NCHW)."""
    wg, bg, wx, bx, wpsi, bpsi = params
    n, cg, h, w = g.shape
    cin = x.shape[1]
    g2 = jnp.transpose(g, (0, 2, 3, 1)).reshape(-1, cg)
    x2 = jnp.transpose(x, (0, 2, 3, 1)).reshape(-1, cin)
    g1 = g2 @ wg + bg
    x1 = x2 @ wx + bx
    hdd = jnp.maximum(g1 + x1, 0.0)
    psi = jax.nn.sigmoid(hdd @ wpsi + bpsi)
    out = x2 * psi
    return jnp.transpose(out.reshape(n, h, w, cin), (0, 3, 1, 2))


if __name__ == "__main__":
    key = jax.random.PRNGKey(0)
    kg, kx, kp = jax.random.split(key, 3)

    N, H, W = 2, 16, 16
    gating_channels, in_channels, inter_channels = 4, 4, 8

    g = jax.random.normal(kg, (N, gating_channels, H, W), jnp.float32)
    x = jax.random.normal(kx, (N, in_channels, H, W), jnp.float32)
    params = init_params(kp, gating_channels, in_channels, inter_channels)

    out = attention_block(g, x, params)
    out = jax.block_until_ready(out)

    ref = attention_block_ref(g, x, params)
    assert out.shape == (N, in_channels, H, W)
    assert jnp.allclose(out, ref, atol=1e-4, rtol=1e-4), "mismatch vs reference"

    print("KERNEL_OK")
</pallas_src>

<mosaic_0001>
module attributes {stable_mosaic.version = 11 : i64} {
  func.func @_attention_block_kernel(%arg0: i32, %arg1: i32, %arg2: memref<1x4x256xf32, #tpu.memory_space<vmem>>, %arg3: memref<1x4x256xf32, #tpu.memory_space<vmem>>, %arg4: memref<8x11xf32, #tpu.memory_space<vmem>>, %arg5: memref<1x4x256xf32, #tpu.memory_space<vmem>>) attributes {dimension_semantics = [#tpu.dimension_semantics<parallel>, #tpu.dimension_semantics<parallel>], iteration_bounds = array<i64: 2, 1>, scalar_prefetch = 0 : i64, scratch_operands = 0 : i64, tpu.core_type = #tpu.core_type<tc>, window_params = [{transform_indices = @transform_0, window_bounds = array<i64: 1, 4, 256>}, {transform_indices = @transform_1, window_bounds = array<i64: 1, 4, 256>}, {pipeline_mode = #tpu.pipeline_mode<synchronous>, transform_indices = @transform_2, window_bounds = array<i64: 8, 11>}, {transform_indices = @transform_3, window_bounds = array<i64: 1, 4, 256>}]} {
    %c0 = arith.constant 0 : index
    %c0_0 = arith.constant 0 : index
    %0 = vector.load %arg4[%c0, %c0_0] : memref<8x11xf32, #tpu.memory_space<vmem>>, vector<8x11xf32>
    %1 = vector.extract_strided_slice %0 {offsets = [0, 0], sizes = [8, 4], strides = [1, 1]} : vector<8x11xf32> to vector<8x4xf32>
    %2 = vector.extract_strided_slice %0 {offsets = [0, 4], sizes = [8, 4], strides = [1, 1]} : vector<8x11xf32> to vector<8x4xf32>
    %3 = vector.extract_strided_slice %0 {offsets = [0, 8], sizes = [8, 1], strides = [1, 1]} : vector<8x11xf32> to vector<8x1xf32>
    %4 = vector.extract_strided_slice %0 {offsets = [0, 9], sizes = [8, 1], strides = [1, 1]} : vector<8x11xf32> to vector<8x1xf32>
    %5 = vector.extract_strided_slice %0 {offsets = [0, 10], sizes = [1, 1], strides = [1, 1]} : vector<8x11xf32> to vector<1x1xf32>
    %c0_1 = arith.constant 0 : index
    %c0_2 = arith.constant 0 : index
    %c0_3 = arith.constant 0 : index
    %6 = vector.load %arg2[%c0_1, %c0_2, %c0_3] : memref<1x4x256xf32, #tpu.memory_space<vmem>>, vector<1x4x256xf32>
    %7 = vector.shape_cast %6 : vector<1x4x256xf32> to vector<4x256xf32>
    %c0_4 = arith.constant 0 : index
    %c0_5 = arith.constant 0 : index
    %c0_6 = arith.constant 0 : index
    %8 = vector.load %arg3[%c0_4, %c0_5, %c0_6] : memref<1x4x256xf32, #tpu.memory_space<vmem>>, vector<1x4x256xf32>
    %9 = vector.shape_cast %8 : vector<1x4x256xf32> to vector<4x256xf32>
    %cst = arith.constant dense<0.000000e+00> : vector<8x256xf32>
    %10 = tpu.matmul %1, %7, %cst {dimension_numbers = #tpu.dot_dimension_numbers<[1], [0], [0], [1], [0, 0, 1, 1], [], []>, precision = #tpu.contract_precision<fp32>} : vector<8x4xf32>, vector<4x256xf32>, vector<8x256xf32> -> vector<8x256xf32>
    %cst_7 = arith.constant dense<0.000000e+00> : vector<8x256xf32>
    %11 = tpu.matmul %2, %9, %cst_7 {dimension_numbers = #tpu.dot_dimension_numbers<[1], [0], [0], [1], [0, 0, 1, 1], [], []>, precision = #tpu.contract_precision<fp32>} : vector<8x4xf32>, vector<4x256xf32>, vector<8x256xf32> -> vector<8x256xf32>
    %12 = arith.addf %10, %11 : vector<8x256xf32>
    %13 = vector.broadcast %3 : vector<8x1xf32> to vector<8x256xf32>
    %14 = arith.addf %12, %13 : vector<8x256xf32>
    %cst_8 = arith.constant 0.000000e+00 : f32
    %15 = vector.broadcast %cst_8 : f32 to vector<8x256xf32>
    %16 = arith.maximumf %14, %15 : vector<8x256xf32>
    %17 = vector.broadcast %4 : vector<8x1xf32> to vector<8x256xf32>
    %18 = arith.mulf %16, %17 : vector<8x256xf32>
    %cst_9 = arith.constant dense<0.000000e+00> : vector<256xf32>
    %19 = vector.multi_reduction <add>, %18, %cst_9 [0] : vector<8x256xf32> to vector<256xf32>
    %20 = vector.shape_cast %19 : vector<256xf32> to vector<1x256xf32>
    %21 = vector.broadcast %5 : vector<1x1xf32> to vector<1x256xf32>
    %22 = arith.addf %20, %21 : vector<1x256xf32>
    %23 = arith.negf %22 : vector<1x256xf32>
    %24 = math.exp %23 : vector<1x256xf32>
    %cst_10 = arith.constant 1.000000e+00 : f32
    %25 = vector.broadcast %cst_10 : f32 to vector<1x256xf32>
    %26 = arith.addf %25, %24 : vector<1x256xf32>
    %27 = arith.divf %25, %26 : vector<1x256xf32>
    %28 = vector.broadcast %27 : vector<1x256xf32> to vector<4x256xf32>
    %29 = arith.mulf %9, %28 : vector<4x256xf32>
    %c0_11 = arith.constant 0 : index
    %c0_12 = arith.constant 0 : index
    %c0_13 = arith.constant 0 : index
    %30 = vector.load %arg5[%c0_11, %c0_12, %c0_13] : memref<1x4x256xf32, #tpu.memory_space<vmem>>, vector<1x4x256xf32>
    %31 = vector.shape_cast %30 : vector<1x4x256xf32> to vector<4x256xf32>
    %32 = vector.shape_cast %29 : vector<4x256xf32> to vector<1x4x256xf32>
    tpu.vector_store %arg5[%c0_11, %c0_12, %c0_13], %32 {strides = array<i32>} : memref<1x4x256xf32, #tpu.memory_space<vmem>>, vector<1x4x256xf32>,
    return
  }
  func.func @transform_0(%arg0: i32, %arg1: i32) -> (i32, i32, i32) {
    %c0_i32 = arith.constant 0 : i32
    %c0_i32_0 = arith.constant 0 : i32
    return %arg0, %c0_i32, %arg1 : i32, i32, i32
  }
  func.func @transform_1(%arg0: i32, %arg1: i32) -> (i32, i32, i32) {
    %c0_i32 = arith.constant 0 : i32
    %c0_i32_0 = arith.constant 0 : i32
    return %arg0, %c0_i32, %arg1 : i32, i32, i32
  }
  func.func @transform_2(%arg0: i32, %arg1: i32) -> (i32, i32) {
    %c0_i32 = arith.constant 0 : i32
    %c0_i32_0 = arith.constant 0 : i32
    %c0_i32_1 = arith.constant 0 : i32
    return %c0_i32, %c0_i32_0 : i32, i32
  }
  func.func @transform_3(%arg0: i32, %arg1: i32) -> (i32, i32, i32) {
    %c0_i32 = arith.constant 0 : i32
    %c0_i32_0 = arith.constant 0 : i32
    return %arg0, %c0_i32, %arg1 : i32, i32, i32
  }
}

</mosaic_0001>

<bundles_post_ra>
// kernel: tpu_custom_call.1
= control target key start
LH: loop header
LB: loop body
LE: loop exit
PB: predicated region body
PF: predicated region fallthrough
CT: control target
= control target key end

     0   :  { %s2061_s0 = inlined_call_operand.hbm [shape: f32[2,4,256], index: 0, kind: input, shape index: {}]   ;;  %s2062_s1 = inlined_call_operand.hbm [shape: f32[2,4,256], index: 1, kind: input, shape index: {}]   ;;  %s2063_s2 = inlined_call_operand.hbm [shape: f32[8,11], index: 2, kind: input, shape index: {}]   ;;  %s2064_s3 = inlined_call_operand.hbm [shape: f32[2,4,256], index: 3, kind: output, shape index: {}]  }
   0x1   :  { %2070 = sst [smem:[#allocation14_spill]] %s2063_s2 }
   0x2   :  { %8 = vsyncpa [#allocation3], 0 }
   0x3   :  { %10 = vsyncpa [#allocation3 + $0x1], 0 }
   0x4   :  { %11 = vsyncpa [#allocation6], 0 }
   0x5   :  { %13 = vsyncpa [#allocation6 + $0x1], 0 }
   0x6   :  { %14 = vsyncpa [#allocation4], 0 }
   0x7   :  { %16 = vsyncpa [#allocation4 + $0x1], 0  ;;  %s1764_s12 = smov 0   ;;  %s1766_s13 = smov 0  }
   0x8   :  { %s1768_s14 = smov 0   ;;  %s1770_s15 = smov 0  }
   0x9   :  { %s1772_s16 = smov 0   ;;  %s1774_s17 = smov 0  }
   0xa LB: > { %s1795_s18 = sadd.s32 4294967295, %s1733_s17   ;;  %s1411_s19 = sadd.s32 4294967294, %s1733_s17   ;;  %s1733_s17 = sphi %s1774_s17, %s22_s17   ;;  %s1729_s16 = sphi %s1772_s16, %s2094_s16   ;;  %s1725_s15 = sphi %s1770_s15, %s2093_s15   ;;  %s1721_s14 = sphi %s1768_s14, %s2092_s14   ;;  %s1717_s13 = sphi %s1766_s13, %s2091_s13   ;;  %s1713_s12 = sphi %s1764_s12, %s2090_s12  }
   0xb   : > { %p56_p0 = scmp.ne.s32.totalorder %s1717_s13, %s1713_s12  ;;  %p2065_p1 = scmp.eq.s32.totalorder %s1795_s18, 0 }
   0xc   : > { %p137_p3 = scmp.eq.s32.totalorder %s1411_s19, 1  ;;  %p1412_p5 = scmp.ge.s32.totalorder %s1733_s17, 1 }
   0xd   : > { %p1804_p4 = por %p2065_p1, %p56_p0  ;;  %p144_p7 = scmp.lt.s32.totalorder %s1733_s17, 3 }
   0xe   : > { %p1809_p6 = por %p137_p3, %p56_p0  ;;  %s1735_s23 = smov [#allocation7]  }
   0xf   : > { %s2071_s20 = scalar_select %p1804_p4, 1, 0 }
  0x10   : > { %s2072_s21 = scalar_select %p1809_p6, 1, 0 }
  0x11   : > { %p1814_p8 = pnand %p1412_p5, %p144_p7  ;;  %s157_s24 = sshll.u32 %s1735_s23, 4  ;;  %s158_s24 = int_to_ptr.vmem [resolvable:$true] %s157_s24 }
  0x12   : > { %s34_s26 = sadd.s32 1, %s1729_s16  ;;  %s43_s27 = sadd.s32 1, %s1721_s14 }
  0x13   : > { %s2073_s22 = scalar_select %p1814_p8, 1, 0 }
  0x14   : > { %p1468_p10 = pneg %p1814_p8  ;;  %p1829_p12 = scmp.ge.s32.totalorder %s34_s26, 2 }
  0x15   : > { %s2076_s2 = sld [smem:[#allocation14_spill]] }
  0x16   : > { %p1823_p11 = pnand %p1468_p10, %p2065_p1 }
  0x17   : > { %s2075_s28 = scalar_select %p1829_p12, 1, 0 }
  0x18   : > { %p1557_p0 = pneg %p1823_p11 }
  0x1b   : > { %s1555_s4 = scalar_lea.hbm %s2076_s2, 128 }
  0x1c   : > { %p1556_p13 = scmp.ne.s32.totalorder %s2076_s2, %s1555_s4  ;;  %p1562_p7 = scmp.lt.u32.totalorder %s1555_s4, %s2076_s2 }
  0x1e   : > { %p1558_p3 = pnand %p1557_p0, %p1556_p13 }
  0x20   : > { %p1559_p5 = pneg %p1558_p3 }
  0x22   : > { %p1564_p10 = pnand %p1562_p7, %p1559_p5 }
  0x24   : > { %1567 = shalt.err (!%p1564_p10)
}
  0x25   : > { %s1568_s9 = scalar_lea.vmem %s158_s24, 128  ;;  %p1576_p6 = scmp.lt.s32.totalorder %s158_s24, %s158_s24 }
  0x26   : > { %p1569_p9 = scmp.ne.s32.totalorder %s158_s24, %s1568_s9  ;;  %p1577_p4 = scmp.lt.s32.totalorder %s1568_s9, %s1568_s9 }
  0x28   : > { %p1571_p1 = pnand %p1569_p9, %p1557_p0  ;;  %p1578_p8 = por %p1577_p4, %p1576_p6 }
  0x2a   : > { %p1572_p2 = pneg %p1571_p1 }
  0x2c   : > { %p1579_p12 = pnand %p1578_p8, %p1572_p2 }
  0x2e   : > { %1582 = shalt.err (!%p1579_p12)
}
  0x2f   : > { %1471 = dma.hbm_to_vmem [thread:$0]  (!%p1823_p11), %s2076_s2, 128, %s158_s24, [#allocation6]  }
  0x30   : > { %p2077_p1 = scmp.ne.s32.totalorder %s2075_s28, 0  ;;  %p50_p2 = scmp.ne.s32.totalorder %s1721_s14, %s1717_s13 }
  0x31   : > { %p51_p4 = scmp.eq.s32.totalorder %s1733_s17, 0  ;;  %p1484_p6 = scmp.lt.s32.totalorder %s1733_s17, 2 }
  0x32   : > { %s2096_s26 = smov (%p2077_p1, %s34_s26), 0  ;;  %p2079_p12 = scmp.eq.s32.totalorder %s1795_s18, 1 }
  0x33   : > { %2078 = sst [smem:[#allocation13_spill]] %s2096_s26  ;;  %s38_s19 = ssub.s32 %s1729_s16, %s2096_s26 }
  0x34   : > { %p41_p8 = scmp.eq.s32.totalorder %s38_s19, 0  ;;  %p52_p9 = por %p51_p4, %p50_p2 }
  0x35   : > { %p1861_p13 = por %p2079_p12, %p50_p2  ;;  %s168_s25 = sand.u32 1, %s1721_s14  }
  0x36   : > { %s1869_s29 = scalar_select %p41_p8, %s1721_s14, %s43_s27  }
  0x37   : > { %s2080_s23 = scalar_select %p1861_p13, 1, 0 }
  0x38   : > { %s1871_s24 = sshll.u32 %s168_s25, 3  ;;  %s1433_s28 = sshll.u32 %s1729_s16, 7 }
  0x39   : > { %s1877_s5 = scalar_lea.hbm %s2061_s0, %s1433_s28  ;;  %s172_s6 = scalar_lea.vmem [#allocation2], %s1871_s24 }
  0x3a   : > { %s182_s7 = sshll.u32 %s172_s6, 4  ;;  %p1882_p11 = pnand %p1484_p6, %p52_p9  ;;  %s1880_s7 = int_to_ptr.vmem [resolvable:$true] %s182_s7 }
  0x3b   : > { %s1889_s10 = scalar_lea.hbm %s2062_s1, %s1433_s28  ;;  %s189_s11 = sand.u32 1, %s1733_s17  }
  0x3c   : > { %s169_s19 = scalar_lea.sflag [#allocation3], %s168_s25  ;;  %s1583_s30 = scalar_lea.hbm %s1877_s5, 128 }
  0x3d   : > { %p1584_p0 = scmp.ne.s32.totalorder %s1877_s5, %s1583_s30  ;;  %p1585_p3 = pneg %p1882_p11 }
  0x3e   : > { %s1588_s2 = scalar_lea.hbm %s2061_s0, 256  ;;  %p1589_p10 = scmp.lt.u32.totalorder %s1877_s5, %s2061_s0 }
  0x3f   : > { %p1586_p5 = pnand %p1585_p3, %p1584_p0  ;;  %p1590_p1 = scmp.lt.u32.totalorder %s1588_s2, %s1583_s30 }
  0x40   : > { %p1592_p4 = scmp.lt.u32.totalorder %s1583_s30, %s1877_s5 }
  0x41   : > { %p1587_p7 = pneg %p1586_p5  ;;  %p1591_p2 = por %p1590_p1, %p1589_p10 }
  0x43   : > { %p1593_p6 = por %p1592_p4, %p1591_p2 }
  0x45   : > { %p1594_p8 = pnand %p1593_p6, %p1587_p7 }
  0x47   : > { %1597 = shalt.err (!%p1594_p8)
}
  0x48   : > { %s1598_s25 = scalar_lea.vmem %s1880_s7, 128  ;;  %s1736_s28 = smov [#allocation2]  }
  0x49   : > { %p1599_p9 = scmp.ne.s32.totalorder %s1880_s7, %s1598_s25  ;;  %s1603_s9 = sshll.u32 %s1736_s28, 4  ;;  %s1604_s9 = int_to_ptr.vmem [resolvable:$false] %s1603_s9 }
  0x4a   : > { %s1605_s26 = scalar_lea.vmem %s1604_s9, 256  ;;  %p1606_p5 = scmp.lt.s32.totalorder %s1880_s7, %s1604_s9 }
  0x4b   : > { %p1601_p12 = pnand %p1599_p9, %p1585_p3  ;;  %p1607_p10 = scmp.lt.s32.totalorder %s1605_s26, %s1598_s25 }
  0x4d   : > { %p1602_p0 = pneg %p1601_p12  ;;  %p1608_p1 = por %p1607_p10, %p1606_p5 }
  0x4f   : > { %p1609_p2 = pnand %p1608_p1, %p1602_p0 }
  0x51   : > { %1612 = shalt.err (!%p1609_p2)
}
  0x52   : > { %1475 = dma.hbm_to_vmem [thread:$0]  (!%p1882_p11), %s1877_s5, 128, %s1880_s7, %s169_s19  }
  0x53   : > { %s193_s2 = scalar_lea.vmem [#allocation5], %s1871_s24  ;;  %s190_s4 = scalar_lea.sflag [#allocation6], %s189_s11 }
  0x54   : > { %s203_s30 = sshll.u32 %s193_s2, 4  ;;  %s1613_s6 = scalar_lea.hbm %s1889_s10, 128  ;;  %s204_s30 = int_to_ptr.vmem [resolvable:$true] %s203_s30 }
  0x55   : > { %p1614_p7 = scmp.ne.s32.totalorder %s1889_s10, %s1613_s6  ;;  %s1618_s28 = scalar_lea.hbm %s2062_s1, 256 }
  0x56   : > { %p1619_p8 = scmp.lt.u32.totalorder %s1889_s10, %s2062_s1  ;;  %p1620_p9 = scmp.lt.u32.totalorder %s1618_s28, %s1613_s6 }
  0x57   : > { %p1616_p4 = pnand %p1614_p7, %p1585_p3  ;;  %p1622_p0 = scmp.lt.u32.totalorder %s1613_s6, %s1889_s10 }
  0x58   : > { %p1621_p12 = por %p1620_p9, %p1619_p8 }
  0x59   : > { %p1617_p6 = pneg %p1616_p4 }
  0x5a   : > { %p1623_p5 = por %p1622_p0, %p1621_p12 }
  0x5c   : > { %p1624_p10 = pnand %p1623_p5, %p1617_p6 }
  0x5e   : > { %1627 = shalt.err (!%p1624_p10)
}
  0x5f   : > { %s1628_s24 = scalar_lea.vmem %s204_s30, 128  ;;  %s1737_s5 = smov [#allocation5]  }
  0x60   : > { %p1629_p1 = scmp.ne.s32.totalorder %s204_s30, %s1628_s24  ;;  %s1633_s7 = sshll.u32 %s1737_s5, 4  ;;  %s1634_s7 = int_to_ptr.vmem [resolvable:$false] %s1633_s7 }
  0x61   : > { %s1635_s11 = scalar_lea.vmem %s1634_s7, 256  ;;  %p1636_p4 = scmp.lt.s32.totalorder %s204_s30, %s1634_s7 }
  0x62   : > { %p1631_p2 = pnand %p1629_p1, %p1585_p3  ;;  %p1637_p13 = scmp.lt.s32.totalorder %s1635_s11, %s1628_s24 }
  0x64   : > { %p1632_p7 = pneg %p1631_p2  ;;  %p1638_p8 = por %p1637_p13, %p1636_p4 }
  0x66   : > { %p1639_p9 = pnand %p1638_p8, %p1632_p7 }
  0x68   : > { %1642 = shalt.err (!%p1639_p9)
}
  0x69   : > { %1478 = dma.hbm_to_vmem [thread:$0]  (!%p1882_p11), %s1889_s10, 128, %s204_s30, %s190_s4  }
  0x6a   : > { %p2082_p6 = scmp.ne.s32.totalorder %s2073_s22, 0 }
  0x6b   : > { %s1942_s19 = sand.u32 (!%p2082_p6), 1, %s1717_s13   ;;  %p2083_p13 = scmp.ne.s32.totalorder (!%p2082_p6), %s2071_s20, 0 }
  0x6c   : > { %212 = sbr.rel (%p2082_p6) target bundleno = 571 (0x23b), region = 32  ;;  %s1945_s2 = sshll.u32 (!%p2082_p6), %s1942_s19, 3 }
  0x6d   : > { %s215_s6 = scalar_lea.sflag (!%p2082_p6), [#allocation3], %s1942_s19  ;;  %s218_s8 = scalar_lea.vmem (!%p2082_p6), [#allocation2], %s1945_s2 }
  0x73   : > { %1696 = dma.done.wait (%p2083_p13), %s215_s6, 128  }
  0x74   : > { %1698 = vsyncadd (%p2083_p13), %s215_s6, 4294967168  ;;  %s223_s22 = sand.u32 1, %s1795_s18   ;;  %s227_s10 = scalar_lea.vmem [#allocation5], %s1945_s2 }
  0x75   : > { %s224_s27 = scalar_lea.sflag [#allocation6], %s223_s22 }
  0x76   : > { %1700 = dma.done.wait (%p2083_p13), %s224_s27, 128  }
  0x77   : > { %1702 = vsyncadd (%p2083_p13), %s224_s27, 4294967168  ;;  %p2084_p11 = scmp.eq.s32.totalorder %s1795_s18, 0 }
  0x79   : > { %1704 = dma.done.wait (%p2084_p11), [#allocation6], 128   ;;  %p2085_p3 = pmov %p2084_p11 }
  0x7a   : > { %v1738_v0 = vmov 0.0   ;;  %vm273_vm0 = vcmask 1043456   ;;  %vm270_vm1 = vcmask 31744   ;;  %v1965_v1 = vld [vmem:[#allocation7] sm:$0xff]  ;;  %v1967_v3 = vld [vmem:[%s227_s10] sm:$0xff]  ;;  %s1739_s20 = smov 124  }
  0x7b   : > { %1706 = vsyncadd (%p2085_p3), [#allocation6], 4294967168  ;;  %817 = vmatprep.mubr.f32.mxu0 %v1738_v0  ;;  %344 = vmatprep.mubr.f32.mxu1 %v1738_v0  ;;  %v263_v2 = vld [vmem:[%s218_s8] sm:$0xff]  ;;  %v745_v6 = vsel %vm270_vm1, %v1965_v1, 0  ;;  %v269_v7 = vcombine.high %v1967_v3, %v1967_v3  ;;  %v274_v10 = vsel %vm273_vm0, %v1967_v3, 0  ;;  %v1740_v32 = vmov 8  }
  0x7c   : > { %266 = vrot.lane.b32.xlu0 %v1965_v1, %s1739_s20  ;;  %v744_v4 = vcombine.high %v263_v2, %v263_v2  ;;  %v747_v5 = vsel %vm273_vm0, %v263_v2, 0  ;;  %v818_v9 = vand.u32 4294901760, %v745_v6  ;;  %v1975_v13 = vand.u32 4294901760, %v274_v10  ;;  %s1435_s18 = sshll.u32 %s1725_s15, 7  ;;  %s258_s30 = scalar_lea.vmem [#allocation8], %s1945_s2 }
  0x7d   : > { %v753_v8 = vand.u32 4294901760, %v747_v5  ;;  %v276_v12 = vsel %vm273_vm0, %v269_v7, 0  ;;  %1541 = vset.pattern.permute.xlu0 %v1740_v32  ;;  %v1741_v33 = vmov 9   ;;  %v1742_v34 = vmov 10   ;;  %s1291_s4 = sshll.u32 %s258_s30, 4  ;;  %s2012_s9 = scalar_lea.hbm %s2064_s3, %s1435_s18  ;;  %s2014_s4 = int_to_ptr.vmem [resolvable:$true] %s1291_s4 }
  0x7e   : > { %v749_v11 = vsel %vm273_vm0, %v744_v4, 0  ;;  %v819_v16 = vsub.f32 %v745_v6, %v818_v9  ;;  %v1977_v17 = vand.u32 4294901760, %v276_v12  ;;  %1542 = vset.pattern.permute.xlu1 %v1741_v33  ;;  %v363_v35 = vsub.f32 %v274_v10, %v1975_v13  ;;  %s1275_s26 = scalar_lea.sflag [#allocation4], %s1942_s19  ;;  %s1643_s24 = scalar_lea.vmem %s2014_s4, 128 }
  0x7f   : > { %v751_v14 = vand.u32 4294901760, %v749_v11  ;;  %v836_v15 = vsub.f32 %v747_v5, %v753_v8  ;;  %1225 = vperm.xlu1 %1542, %v1965_v1   ;;  %p1644_p12 = scmp.ne.s32.totalorder %s2014_s4, %s1643_s24  ;;  %p2086_p0 = scmp.ne.s32.totalorder %s2080_s23, 0 }
  0x80   : > { %v820_v18 = vand.u32 4294901760, %v819_v16  ;;  %279 = vmatprep.subr.mxu1 %v1977_v17  ;;  %v1981_v21 = vsub.f32 %v276_v12, %v1977_v17  ;;  %1217 = vperm.xlu0 %1541, %v1965_v1   ;;  %v364_v38 = vand.u32 4294901760, %v363_v35  ;;  %s1743_s15 = smov [#allocation8]  }
  0x81   : > { %752 = vmatprep.subr.mxu0 %v751_v14  ;;  %v830_v19 = vsub.f32 %v749_v11, %v751_v14  ;;  %v837_v20 = vand.u32 4294901760, %v836_v15  ;;  %281 = vmatpush1.msra.mxu1 %v1975_v13  ;;  %p1645_p5 = pnand %p1644_p12, %p2086_p0  ;;  %s1647_s5 = sshll.u32 %s1743_s15, 4  ;;  %s1648_s5 = int_to_ptr.vmem [resolvable:$false] %s1647_s5 }
  0x82   : > { %754 = vmatpush1.msra.mxu0 %v753_v8  ;;  %v821_v22 = vsub.f32 %v819_v16, %v820_v18  ;;  %v358_v25 = vand.u32 4294901760, %v1981_v21  ;;  %v365_v41 = vsub.f32 %v363_v35, %v364_v38  ;;  %s1649_s7 = scalar_lea.vmem %s1648_s5, 256  ;;  %p1650_p1 = scmp.lt.s32.totalorder %s2014_s4, %s1648_s5 }
  0x83   : > { %v831_v23 = vand.u32 4294901760, %v830_v19  ;;  %v838_v24 = vsub.f32 %v836_v15, %v837_v20  ;;  %1543 = vset.pattern.permute.xlu1 %v1742_v34  ;;  %p1646_p10 = pneg %p1645_p5  ;;  %p1651_p2 = scmp.lt.s32.totalorder %s1649_s7, %s1643_s24 }
  0x84   : > { %v822_v26 = vand.u32 4294901760, %v821_v22  ;;  %v359_v28 = vsub.f32 %v1981_v21, %v358_v25  ;;  %1544 = vset.pattern.permute.xlu0 %v1742_v34  ;;  %1243 = vperm.xlu1 %1543, %v1965_v1   ;;  %v366_v44 = vand.u32 4294901760, %v365_v41 }
  0x85   : > { %v832_v27 = vsub.f32 %v830_v19, %v831_v23  ;;  %v839_v29 = vand.u32 4294901760, %v838_v24  ;;  %p1652_p7 = por %p1651_p2, %p1650_p1 }
  0x86   : > { %823 = vmatmul.mubr.f32.vlgmr.msra.gmra.mrb[0].mxu0 %v822_v26  ;;  %v360_v31 = vand.u32 4294901760, %v359_v28 }
  0x87   : > { %v833_v30 = vand.u32 4294901760, %v832_v27  ;;  %903 = vmatprep.mubr.f32.mxu0 %v1738_v0  ;;  %p1653_p4 = pnand %p1652_p7, %p1646_p10 }
  0x88   : > { %361 = vmatprep.subr.mxu1 %v360_v31 }
  0x89   : > { %834 = vmatprep.subr.mxu0 %v833_v30 }
  0x8a   : > { %840 = vmatpush1.msra.mxu0 %v839_v29 }
  0x8b   : > { %913 = vmatprep.subr.mxu0 %v830_v19 }
  0x8e   : > { %905 = vmatmul.mubr.f32.vlgmr.msra.gmra.mrb[0].mxu0 %v818_v9 }
  0x8f   : > { %916 = vmatpush1.msra.mxu0 %v836_v15  ;;  %979 = vmatprep.mubr.f32.mxu0 %v1738_v0 }
  0x90   : > { %989 = vmatprep.subr.mxu0 %v751_v14 }
  0x96   : > { %982 = vmatmul.mubr.f32.vlgmr.msra.gmra.mrb[0].mxu0 %v819_v16 }
  0x97   : > { %991 = vmatpush1.msra.mxu0 %v753_v8  ;;  %1054 = vmatprep.mubr.f32.mxu0 %v1738_v0 }
  0x98   : > { %1067 = vmatprep.subr.mxu0 %v831_v23 }
  0x9e   : > { %1058 = vmatmul.mubr.f32.vlgmr.msra.gmra.mrb[0].mxu0 %v820_v18  ;;  %v1260_v18 = vlaneseq }
  0x9f   : > { %1071 = vmatpush1.msra.mxu0 %v837_v20  ;;  %1134 = vmatprep.mubr.f32.mxu0 %v1738_v0 }
  0xa0   : > { %1143 = vmatprep.subr.mxu0 %v751_v14  ;;  %v1261_v19 = vshrl.u32 %v1260_v18, 7 }
  0xa2   : > { %v1262_v20 = vsub.s32 0, %v1261_v19 }
  0xa6   : > { %1136 = vmatmul.mubr.f32.vlgmr.msra.gmra.mrb[0].mxu0 %v818_v9 }
  0xa7   : > { %1145 = vmatpush1.msra.mxu0 %v753_v8  ;;  %1208 = vmatprep.mubr.f32.mxu0 %v1738_v0 }
  0xae   : > { %1210 = vmatmul.mubr.f32.vlgmr.msra.gmra.mrb[0].mxu0 %v818_v9 }
  0xee   : > { %v267_v36 = vpop.permute.xlu0 %266 }
  0xef   : > { %v271_v37 = vsel %vm270_vm1, %v267_v36, 0 }
  0xf0   : > { %v345_v39 = vand.u32 4294901760, %v271_v37 }
  0xf2   : > { %v346_v40 = vsub.f32 %v271_v37, %v345_v39 }
  0xf4   : > { %v347_v42 = vand.u32 4294901760, %v346_v40 }
  0xf6   : > { %v348_v43 = vsub.f32 %v346_v40, %v347_v42 }
  0xf8   : > { %v349_v45 = vand.u32 4294901760, %v348_v43 }
  0xfa   : > { %350 = vmatmul.mubr.f32.vlgmr.msra.gmra.mrb[0].mxu1 %v349_v45 }
  0xfb   : > { %367 = vmatpush1.msra.mxu1 %v366_v44  ;;  %430 = vmatprep.mubr.f32.mxu1 %v1738_v0 }
  0xfc   : > { %440 = vmatprep.subr.mxu1 %v1981_v21 }
  0xfe   : > { %v1226_v55 = vpop.permute.xlu1 %1225 }
  0xff   : > { %v1218_v49 = vpop.permute.xlu0 %1217 }
 0x102   : > { %432 = vmatmul.mubr.f32.vlgmr.msra.gmra.mrb[0].mxu1 %v345_v39 }
 0x103   : > { %443 = vmatpush1.msra.mxu1 %v363_v35  ;;  %506 = vmatprep.mubr.f32.mxu1 %v1738_v0  ;;  %v1244_v6 = vpop.permute.xlu1 %1243 }
 0x104   : > { %516 = vmatprep.subr.mxu1 %v1977_v17 }
 0x10a   : > { %509 = vmatmul.mubr.f32.vlgmr.msra.gmra.mrb[0].mxu1 %v346_v40 }
 0x10b   : > { %518 = vmatpush1.msra.mxu1 %v1975_v13  ;;  %581 = vmatprep.mubr.f32.mxu1 %v1738_v0 }
 0x10c   : > { %594 = vmatprep.subr.mxu1 %v358_v25 }
 0x112   : > { %585 = vmatmul.mubr.f32.vlgmr.msra.gmra.mrb[0].mxu1 %v347_v42 }
 0x113   : > { %598 = vmatpush1.msra.mxu1 %v364_v38  ;;  %661 = vmatprep.mubr.f32.mxu1 %v1738_v0 }
 0x114   : > { %670 = vmatprep.subr.mxu1 %v1977_v17 }
 0x11a   : > { %663 = vmatmul.mubr.f32.vlgmr.msra.gmra.mrb[0].mxu1 %v345_v39 }
 0x11b   : > { %672 = vmatpush1.msra.mxu1 %v1975_v13  ;;  %735 = vmatprep.mubr.f32.mxu1 %v1738_v0 }
 0x122   : > { %737 = vmatmul.mubr.f32.vlgmr.msra.gmra.mrb[0].mxu1 %v345_v39 }
 0x181   : > { %v1211_v46 = vpop.f32.mrb[0].mxu0 }
 0x182   : > { %v1213_v47 = vpop.f32.mrb[1].mxu0 }
 0x1f5   : > { %v738_v48 = vpop.f32.mrb[0].mxu1 }
 0x1f6   : > { %v1436_v50 = vadd.f32 %v1211_v46, %v738_v48  ;;  %v740_v51 = vpop.f32.mrb[1].mxu1 }
 0x1f7   : > { %v1437_v52 = vadd.f32 %v1213_v47, %v740_v51 }
 0x1f8   : > { %v1220_v53 = vadd.f32 %v1436_v50, %v1218_v49 }
 0x1f9   : > { %v1221_v54 = vadd.f32 %v1437_v52, %v1218_v49 }
 0x1fa   : > { %v1222_v56 = vmax.f32 %v1220_v53, 0.0 }
 0x1fb   : > { %v1223_v57 = vmax.f32 %v1221_v54, 0.0 }
 0x1fc   : > { %v1228_v58 = vmul.f32 %v1226_v55, %v1222_v56 }
 0x1fd   : > { %v1229_v59 = vmul.f32 %v1226_v55, %v1223_v57 }
 0x1fe   : > { %v1230_v60 = vrot.slane %v1228_v58, 4 }
 0x1ff   : > { %v1236_v61 = vrot.slane %v1229_v59, 4 }
 0x200   : > { %v1231_v62 = vadd.f32 %v1230_v60, %v1228_v58 }
 0x201   : > { %v1237_v63 = vadd.f32 %v1236_v61, %v1229_v59 }
 0x202   : > { %v1232_v0 = vrot.slane %v1231_v62, 2 }
 0x203   : > { %v1238_v1 = vrot.slane %v1237_v63, 2 }
 0x204   : > { %v1233_v2 = vadd.f32 %v1232_v0, %v1231_v62 }
 0x205   : > { %v1239_v4 = vadd.f32 %v1238_v1, %v1237_v63 }
 0x206   : > { %v1234_v5 = vrot.slane %v1233_v2, 1 }
 0x207   : > { %v1240_v7 = vrot.slane %v1239_v4, 1 }
 0x208   : > { %v1235_v8 = vadd.f32 %v1234_v5, %v1233_v2 }
 0x209   : > { %v1241_v9 = vadd.f32 %v1240_v7, %v1239_v4 }
 0x20a   : > { %v1246_v10 = vadd.f32 %v1244_v6, %v1235_v8 }
 0x20b   : > { %v1247_v11 = vadd.f32 %v1244_v6, %v1241_v9 }
 0x20c   : > { %v1426_v12 = vmul.f32 -1.442695, %v1246_v10 }
 0x20d   : > { %v1427_v13 = vmul.f32 -1.442695, %v1247_v11 }
 0x20e   : > { %1547 = vpow2.f32 %v1426_v12 }
 0x20f   : > { %1549 = vpow2.f32 %v1427_v13 }
 0x218   : > { %v1548_v14 = vpop.eup %1547 }
 0x219   : > { %v1550_v15 = vpop.eup %1549  ;;  %v1254_v16 = vadd.f32 1.0, %v1548_v14 }
 0x21a   : > { %v1255_v17 = vadd.f32 1.0, %v1550_v15 }
 0x21b   : > { %1551 = vrcp.f32 %v1254_v16 }
 0x21c   : > { %1553 = vrcp.f32 %v1255_v17 }
 0x225   : > { %v1552_v21 = vpop.eup %1551 }
 0x226   : > { %v1554_v22 = vpop.eup %1553  ;;  %v1263_v23 = vrot.slane %v1552_v21, %v1262_v20 }
 0x227   : > { %v1267_v24 = vrot.slane %v1554_v22, %v1262_v20 }
 0x229   : > { %v1270_v25 = vcombine.low %v1263_v23, %v1267_v24 }
 0x22b   : > { %v1272_v26 = vmul.f32 %v1270_v25, %v1967_v3 }
 0x22d   : > { %1273 = vst [vmem:[%s258_s30] sm:$0xff] %v1272_v26 }
 0x22e   : > { %1656 = shalt.err (!%p1653_p4)
}
 0x22f   : > { %s1657_s11 = scalar_lea.hbm %s2012_s9, 128  ;;  %s1661_s6 = scalar_lea.hbm %s2064_s3, 256 }
 0x230   : > { %p1658_p8 = scmp.ne.s32.totalorder %s2012_s9, %s1657_s11  ;;  %p1662_p13 = scmp.lt.u32.totalorder %s2012_s9, %s2064_s3 }
 0x231   : > { %p1663_p11 = scmp.lt.u32.totalorder %s1661_s6, %s1657_s11  ;;  %p1665_p12 = scmp.lt.u32.totalorder %s1657_s11, %s2012_s9 }
 0x232   : > { %p1659_p9 = pnand %p1658_p8, %p2086_p0 }
 0x233   : > { %p1664_p3 = por %p1663_p11, %p1662_p13 }
 0x234   : > { %p1660_p6 = pneg %p1659_p9 }
 0x235   : > { %p1666_p5 = por %p1665_p12, %p1664_p3 }
 0x237   : > { %p1667_p10 = pnand %p1666_p5, %p1660_p6 }
 0x239   : > { %1670 = shalt.err (!%p1667_p10)
}
 0x23a   : > { %1466 = dma.vmem_to_hbm [thread:$0]  (%p2086_p0), %s2014_s4, 128, %s2012_s9, %s1275_s26  }
 0x23b PF: > { %s1303_s27 = sand.u32 1, %s1713_s12   ;;  %p2087_p1 = scmp.ne.s32.totalorder %s2072_s21, 0 }
 0x23c   : > { %p2088_p2 = scmp.ge.s32.totalorder %s1733_s17, 2  ;;  %s1304_s10 = scalar_lea.sflag [#allocation4], %s1303_s27 }
 0x23e   : > { %p1480_p7 = pnand %p2088_p2, %p2087_p1 }
 0x240   : > { %1708 = dma.done.wait (!%p1480_p7), %s1304_s10, 128  }
 0x241   : > { %1710 = vsyncadd (!%p1480_p7), %s1304_s10, 4294967168  ;;  %s22_s17 = sadd.s32 1, %s1733_s17   ;;  %s2089_s23 = sld [smem:[#allocation13_spill]] }
 0x242   : > { %p19_p4 = scmp.ge.s32.totalorder %s22_s17, 4   ;;  %s2090_s12 = smov %s1717_s13 }
 0x243   : > { %s2091_s13 = smov %s1721_s14  ;;  %s2092_s14 = smov %s1869_s29 }
 0x244   : > { %s2093_s15 = smov %s1729_s16  ;;  %21 = sbr.rel (!%p19_p4) target bundleno = 10 (0xa), region = 94 }
 0x247   : > { %s2094_s16 = smov %s2089_s23 }
 0x24b   :  { %1309 = vsyncpa [#allocation3], 1 }
 0x24c   :  { %1311 = vsyncpa [#allocation3 + $0x1], 1 }
 0x24d   :  { %1312 = vsyncpa [#allocation6], 1 }
 0x24e   :  { %1314 = vsyncpa [#allocation6 + $0x1], 1 }
 0x24f   :  { %1315 = vsyncpa [#allocation4], 1 }
 0x250   :  { %1317 = vsyncpa [#allocation4 + $0x1], 1 }

</bundles_post_ra>
